<compile_context>
chip_gen: v7x
topology: tpu7x:2x2x1
jax: 0.10.0
libtpu: 0.0.40
codegen_flags: <defaults>
</compile_context>

<pallas_src>
import functools

import jax
import jax.numpy as jnp
from jax.experimental import pallas as pl
from jax.experimental.pallas import tpu as pltpu


def _round_up(x, m):
    return ((x + m - 1) // m) * m


def _fused_gcn_kernel(a_ref, h0_ref, w_ref, b_ref, o_ref, *, n_layers):
    """All GCN layers fused into one kernel invocation.

    a_ref : (Np, Np) bf16   normalized adjacency (VMEM-resident)
    h0_ref: (Np, Fp) bf16   input node features
    w_ref : (L, Fp, Fp) bf16 stacked layer weights
    b_ref : (L, 1,  Fp) f32  stacked layer biases
    o_ref : (Np, Fp) f32    output node features
    """
    a = a_ref[...]                       # stays in VMEM for all layers
    h = h0_ref[...]                      # bf16 layer-to-layer carry
    out = h.astype(jnp.float32)          # only used if n_layers == 0 (DCE'd)
    for l in range(n_layers):            # static unroll: L is tiny & fixed
        # Aggregation: (D^-1/2 A D^-1/2) @ H  -- normalization baked into A.
        agg = jnp.dot(a, h, preferred_element_type=jnp.float32)
        # Linear transform + bias, f32 accumulation.
        out = (
            jnp.dot(agg.astype(jnp.bfloat16), w_ref[l],
                    preferred_element_type=jnp.float32)
            + b_ref[l]
        )
        h = out.astype(jnp.bfloat16)     # bf16 carry to next layer
    # Single lane-dense writeback to HBM.
    o_ref[...] = out


def _gcn_forward_impl(a_norm, feat, weights, biases):
    """GCN_Model.forward: all layers in one fused pallas_call."""
    N, F_in = feat.shape
    L = len(weights)
    F_out = weights[0].shape[1]
    assert F_in == F_out, "stacked GraphConv layers require in_feats == out_feats"

    # Pad node and feature axes to 128 (lane-dense stores, full MXU tiles).
    Np = _round_up(max(N, 128), 128)
    Fp = _round_up(max(F_out, 128), 128)

    a_pad = jnp.zeros((Np, Np), jnp.bfloat16).at[:N, :N].set(
        a_norm.astype(jnp.bfloat16))
    h_pad = jnp.zeros((Np, Fp), jnp.bfloat16).at[:N, :F_in].set(
        feat.astype(jnp.bfloat16))
    w_stk = jnp.zeros((L, Fp, Fp), jnp.bfloat16).at[:, :F_in, :F_out].set(
        jnp.stack(weights).astype(jnp.bfloat16))
    b_stk = jnp.zeros((L, 1, Fp), jnp.float32).at[:, :, :F_out].set(
        jnp.stack(biases).astype(jnp.float32))

    out_bytes = Np * Fp * 4
    in_bytes = (a_pad.size * 2 + h_pad.size * 2
                + w_stk.size * 2 + b_stk.size * 4)
    cost = pl.CostEstimate(
        flops=L * (2 * Np * Np * Fp + 2 * Np * Fp * Fp),
        transcendentals=0,
        bytes_accessed=in_bytes + out_bytes,
    )

    vmem_spec = pl.BlockSpec(memory_space=pltpu.MemorySpace.VMEM)
    out_pad = pl.pallas_call(
        functools.partial(_fused_gcn_kernel, n_layers=L),
        out_shape=jax.ShapeDtypeStruct((Np, Fp), jnp.float32),
        in_specs=[vmem_spec, vmem_spec, vmem_spec, vmem_spec],
        out_specs=vmem_spec,
        compiler_params=pltpu.CompilerParams(
            # explicit scoped-VMEM budget: resident blocks + kernel temporaries
            vmem_limit_bytes=int(2 * (in_bytes + out_bytes)) + (8 << 20),
        ),
        cost_estimate=cost,
    )(a_pad, h_pad, w_stk, b_stk)

    return out_pad[:N, :F_out]


# One jit around padding/stacking + kernel so the glue fuses with the call
# and the padded normalized adjacency is produced on-device once per call.
gcn_model_forward = jax.jit(_gcn_forward_impl)


def build_norm_adj(adj):
    """Fold DGL 'both' normalization into the dense adjacency.

    adj[dst, src] = 1 for edge src->dst.
    src norm uses out-degree, dst norm uses in-degree, clamped to >= 1.
    """
    out_deg = jnp.maximum(adj.sum(axis=0), 1.0)  # per source node
    in_deg = jnp.maximum(adj.sum(axis=1), 1.0)   # per destination node
    return adj * (in_deg[:, None] ** -0.5) * (out_deg[None, :] ** -0.5)


if __name__ == "__main__":
    N = 64        # number of nodes
    F = 32        # in_feats == out_feats (stacked same-shape GraphConv layers)
    N_LAYERS = 4  # gnn_layer=4

    key = jax.random.PRNGKey(0)
    k_adj, k_feat, k_bias, *k_ws = jax.random.split(key, 3 + N_LAYERS)

    # Deterministic synthetic graph (dense adjacency) and node features.
    adj = (jax.random.uniform(k_adj, (N, N)) < 0.1).astype(jnp.float32)
    feat = jax.random.normal(k_feat, (N, F), dtype=jnp.float32)

    # Deterministic parameters (Xavier-uniform weights, small nonzero biases
    # so the bias-add path is actually exercised).
    limit = (6.0 / (F + F)) ** 0.5
    weights = [
        jax.random.uniform(k, (F, F), minval=-limit, maxval=limit,
                           dtype=jnp.float32)
        for k in k_ws
    ]
    biases = list(0.05 * jax.random.normal(k_bias, (N_LAYERS, 1, F),
                                           dtype=jnp.float32))

    a_norm = build_norm_adj(adj)

    out = gcn_model_forward(a_norm, feat, weights, biases)
    out = jax.block_until_ready(out)

    # Pure-JAX f32 reference of the same forward pass.
    ref = feat
    for w, b in zip(weights, biases):
        ref = a_norm @ ref @ w + b
    assert out.shape == (N, F)
    # bf16 matmul inputs / bf16 carry (f32 accumulation) -> relaxed tolerance.
    assert jnp.allclose(out, ref, atol=5e-2, rtol=5e-2), "mismatch vs reference"

    print("KERNEL_OK")
</pallas_src>

<mosaic_0001>
module attributes {stable_mosaic.version = 11 : i64} {
  func.func @_fused_gcn_kernel(%arg0: memref<128x128xbf16, #tpu.memory_space<vmem>>, %arg1: memref<128x128xbf16, #tpu.memory_space<vmem>>, %arg2: memref<4x128x128xbf16, #tpu.memory_space<vmem>>, %arg3: memref<4x1x128xf32, #tpu.memory_space<vmem>>, %arg4: memref<128x128xf32, #tpu.memory_space<vmem>>) attributes {dimension_semantics = [], scalar_prefetch = 0 : i64, scratch_operands = 0 : i64, tpu.core_type = #tpu.core_type<tc>} {
    %c0 = arith.constant 0 : index
    %c0_0 = arith.constant 0 : index
    %0 = vector.load %arg0[%c0, %c0_0] : memref<128x128xbf16, #tpu.memory_space<vmem>>, vector<128x128xbf16>
    %c0_1 = arith.constant 0 : index
    %c0_2 = arith.constant 0 : index
    %1 = vector.load %arg1[%c0_1, %c0_2] : memref<128x128xbf16, #tpu.memory_space<vmem>>, vector<128x128xbf16>
    %cst = arith.constant dense<0.000000e+00> : vector<128x128xf32>
    %2 = tpu.matmul %0, %1, %cst {dimension_numbers = #tpu.dot_dimension_numbers<[1], [0], [0], [1], [0, 0, 1, 1], [], []>} : vector<128x128xbf16>, vector<128x128xbf16>, vector<128x128xf32> -> vector<128x128xf32>
    %3 = arith.truncf %2 : vector<128x128xf32> to vector<128x128xbf16>
    %c0_3 = arith.constant 0 : index
    %c0_4 = arith.constant 0 : index
    %c0_5 = arith.constant 0 : index
    %4 = vector.load %arg2[%c0_3, %c0_4, %c0_5] : memref<4x128x128xbf16, #tpu.memory_space<vmem>>, vector<1x128x128xbf16>
    %5 = vector.shape_cast %4 : vector<1x128x128xbf16> to vector<128x128xbf16>
    %cst_6 = arith.constant dense<0.000000e+00> : vector<128x128xf32>
    %6 = tpu.matmul %3, %5, %cst_6 {dimension_numbers = #tpu.dot_dimension_numbers<[1], [0], [0], [1], [0, 0, 1, 1], [], []>} : vector<128x128xbf16>, vector<128x128xbf16>, vector<128x128xf32> -> vector<128x128xf32>
    %c0_7 = arith.constant 0 : index
    %c0_8 = arith.constant 0 : index
    %c0_9 = arith.constant 0 : index
    %7 = vector.load %arg3[%c0_7, %c0_8, %c0_9] : memref<4x1x128xf32, #tpu.memory_space<vmem>>, vector<1x1x128xf32>
    %8 = vector.shape_cast %7 : vector<1x1x128xf32> to vector<1x128xf32>
    %9 = vector.broadcast %8 : vector<1x128xf32> to vector<128x128xf32>
    %10 = arith.addf %6, %9 : vector<128x128xf32>
    %11 = arith.truncf %10 : vector<128x128xf32> to vector<128x128xbf16>
    %cst_10 = arith.constant dense<0.000000e+00> : vector<128x128xf32>
    %12 = tpu.matmul %0, %11, %cst_10 {dimension_numbers = #tpu.dot_dimension_numbers<[1], [0], [0], [1], [0, 0, 1, 1], [], []>} : vector<128x128xbf16>, vector<128x128xbf16>, vector<128x128xf32> -> vector<128x128xf32>
    %13 = arith.truncf %12 : vector<128x128xf32> to vector<128x128xbf16>
    %c1 = arith.constant 1 : index
    %c0_11 = arith.constant 0 : index
    %c0_12 = arith.constant 0 : index
    %14 = vector.load %arg2[%c1, %c0_11, %c0_12] : memref<4x128x128xbf16, #tpu.memory_space<vmem>>, vector<1x128x128xbf16>
    %15 = vector.shape_cast %14 : vector<1x128x128xbf16> to vector<128x128xbf16>
    %cst_13 = arith.constant dense<0.000000e+00> : vector<128x128xf32>
    %16 = tpu.matmul %13, %15, %cst_13 {dimension_numbers = #tpu.dot_dimension_numbers<[1], [0], [0], [1], [0, 0, 1, 1], [], []>} : vector<128x128xbf16>, vector<128x128xbf16>, vector<128x128xf32> -> vector<128x128xf32>
    %c1_14 = arith.constant 1 : index
    %c0_15 = arith.constant 0 : index
    %c0_16 = arith.constant 0 : index
    %17 = vector.load %arg3[%c1_14, %c0_15, %c0_16] : memref<4x1x128xf32, #tpu.memory_space<vmem>>, vector<1x1x128xf32>
    %18 = vector.shape_cast %17 : vector<1x1x128xf32> to vector<1x128xf32>
    %19 = vector.broadcast %18 : vector<1x128xf32> to vector<128x128xf32>
    %20 = arith.addf %16, %19 : vector<128x128xf32>
    %21 = arith.truncf %20 : vector<128x128xf32> to vector<128x128xbf16>
    %cst_17 = arith.constant dense<0.000000e+00> : vector<128x128xf32>
    %22 = tpu.matmul %0, %21, %cst_17 {dimension_numbers = #tpu.dot_dimension_numbers<[1], [0], [0], [1], [0, 0, 1, 1], [], []>} : vector<128x128xbf16>, vector<128x128xbf16>, vector<128x128xf32> -> vector<128x128xf32>
    %23 = arith.truncf %22 : vector<128x128xf32> to vector<128x128xbf16>
    %c2 = arith.constant 2 : index
    %c0_18 = arith.constant 0 : index
    %c0_19 = arith.constant 0 : index
    %24 = vector.load %arg2[%c2, %c0_18, %c0_19] : memref<4x128x128xbf16, #tpu.memory_space<vmem>>, vector<1x128x128xbf16>
    %25 = vector.shape_cast %24 : vector<1x128x128xbf16> to vector<128x128xbf16>
    %cst_20 = arith.constant dense<0.000000e+00> : vector<128x128xf32>
    %26 = tpu.matmul %23, %25, %cst_20 {dimension_numbers = #tpu.dot_dimension_numbers<[1], [0], [0], [1], [0, 0, 1, 1], [], []>} : vector<128x128xbf16>, vector<128x128xbf16>, vector<128x128xf32> -> vector<128x128xf32>
    %c2_21 = arith.constant 2 : index
    %c0_22 = arith.constant 0 : index
    %c0_23 = arith.constant 0 : index
    %27 = vector.load %arg3[%c2_21, %c0_22, %c0_23] : memref<4x1x128xf32, #tpu.memory_space<vmem>>, vector<1x1x128xf32>
    %28 = vector.shape_cast %27 : vector<1x1x128xf32> to vector<1x128xf32>
    %29 = vector.broadcast %28 : vector<1x128xf32> to vector<128x128xf32>
    %30 = arith.addf %26, %29 : vector<128x128xf32>
    %31 = arith.truncf %30 : vector<128x128xf32> to vector<128x128xbf16>
    %cst_24 = arith.constant dense<0.000000e+00> : vector<128x128xf32>
    %32 = tpu.matmul %0, %31, %cst_24 {dimension_numbers = #tpu.dot_dimension_numbers<[1], [0], [0], [1], [0, 0, 1, 1], [], []>} : vector<128x128xbf16>, vector<128x128xbf16>, vector<128x128xf32> -> vector<128x128xf32>
    %33 = arith.truncf %32 : vector<128x128xf32> to vector<128x128xbf16>
    %c3 = arith.constant 3 : index
    %c0_25 = arith.constant 0 : index
    %c0_26 = arith.constant 0 : index
    %34 = vector.load %arg2[%c3, %c0_25, %c0_26] : memref<4x128x128xbf16, #tpu.memory_space<vmem>>, vector<1x128x128xbf16>
    %35 = vector.shape_cast %34 : vector<1x128x128xbf16> to vector<128x128xbf16>
    %cst_27 = arith.constant dense<0.000000e+00> : vector<128x128xf32>
    %36 = tpu.matmul %33, %35, %cst_27 {dimension_numbers = #tpu.dot_dimension_numbers<[1], [0], [0], [1], [0, 0, 1, 1], [], []>} : vector<128x128xbf16>, vector<128x128xbf16>, vector<128x128xf32> -> vector<128x128xf32>
    %c3_28 = arith.constant 3 : index
    %c0_29 = arith.constant 0 : index
    %c0_30 = arith.constant 0 : index
    %37 = vector.load %arg3[%c3_28, %c0_29, %c0_30] : memref<4x1x128xf32, #tpu.memory_space<vmem>>, vector<1x1x128xf32>
    %38 = vector.shape_cast %37 : vector<1x1x128xf32> to vector<1x128xf32>
    %39 = vector.broadcast %38 : vector<1x128xf32> to vector<128x128xf32>
    %40 = arith.addf %36, %39 : vector<128x128xf32>
    %c0_31 = arith.constant 0 : index
    %c0_32 = arith.constant 0 : index
    %41 = vector.load %arg4[%c0_31, %c0_32] : memref<128x128xf32, #tpu.memory_space<vmem>>, vector<128x128xf32>
    tpu.vector_store %arg4[%c0_31, %c0_32], %40 {strides = array<i32>} : memref<128x128xf32, #tpu.memory_space<vmem>>, vector<128x128xf32>,
    return
  }
}

</mosaic_0001>

<bundles_post_ra>
// kernel: _gcn_forward_impl.1
= control target key start
LH: loop header
LB: loop body
LE: loop exit
PB: predicated region body
PF: predicated region fallthrough
CT: control target
= control target key end

     0   :  { %s2100_s1 = inlined_call_operand.vmem [shape: bf16[128,128], index: 1, kind: input, shape index: {}]   ;;  %s2101_s0 = inlined_call_operand.vmem [shape: bf16[128,128], index: 0, kind: input, shape index: {}]   ;;  %s2102_s2 = inlined_call_operand.vmem [shape: bf16[4,128,128], index: 2, kind: input, shape index: {}]   ;;  %s2103_s3 = inlined_call_operand.vmem [shape: f32[4,1,128], index: 3, kind: input, shape index: {}]   ;;  %s2104_s4 = inlined_call_operand.vmem [shape: f32[128,128], index: 4, kind: output, shape index: {}]  }
   0x1   :  { %v1775_v0 = vld [vmem:[%s2100_s1] sm:$0xff]   ;;  %v1776_v1 = vld [vmem:[%s2100_s1 + $0x8] sm:$0xff]   ;;  %v1777_v2 = vld [vmem:[%s2100_s1 + $0x10] sm:$0xff]  }
   0x2   :  { %1519 = vmatprep.subr.bf16.mxu0 %v1775_v0  ;;  %v1778_v3 = vld [vmem:[%s2100_s1 + $0x18] sm:$0xff]   ;;  %v1863_v4 = vld [vmem:[%s2101_s0] sm:$0xff]   ;;  %v1780_v6 = vld [vmem:[%s2100_s1 + $0x28] sm:$0xff]  }
   0x3   :  { %1520 = vmatpush3.bf16.msra.mxu0 %v1775_v0  ;;  %1535 = vmatprep.mubr.bf16.mxu0 %v1863_v4  ;;  %v1779_v5 = vld [vmem:[%s2100_s1 + $0x20] sm:$0xff]   ;;  %v1792_v8 = vld [vmem:[%s2102_s2 + $0x8] sm:$0xff]   ;;  %v1781_v9 = vld [vmem:[%s2100_s1 + $0x30] sm:$0xff]  }
   0x4   :  { %1521 = vmatprep.subr.bf16.mxu0 %v1776_v1  ;;  %v1791_v7 = vld [vmem:[%s2102_s2] sm:$0xff]   ;;  %v1793_v10 = vld [vmem:[%s2102_s2 + $0x10] sm:$0xff]   ;;  %v1782_v11 = vld [vmem:[%s2100_s1 + $0x38] sm:$0xff]  }
   0x5   :  { %1551 = vmatprep.subr.bf16.mxu1 %v1791_v7  ;;  %v1794_v12 = vld [vmem:[%s2102_s2 + $0x18] sm:$0xff]   ;;  %v1795_v13 = vld [vmem:[%s2102_s2 + $0x20] sm:$0xff]   ;;  %v1896_v14 = vld [vmem:[%s2101_s0 + $0x8] sm:$0xff]  }
   0x6   :  { %1552 = vmatpush3.bf16.msra.mxu1 %v1791_v7  ;;  %v1901_v15 = vld [vmem:[%s2101_s0 + $0x10] sm:$0xff]   ;;  %v1796_v16 = vld [vmem:[%s2102_s2 + $0x28] sm:$0xff]   ;;  %v1914_v18 = vld [vmem:[%s2101_s0 + $0x18] sm:$0xff]  }
   0x7   :  { %1522 = vmatpush3.bf16.msra.mxu0 %v1776_v1  ;;  %1553 = vmatprep.subr.bf16.mxu1 %v1792_v8  ;;  %v1797_v17 = vld [vmem:[%s2102_s2 + $0x30] sm:$0xff]   ;;  %v1919_v19 = vld [vmem:[%s2101_s0 + $0x20] sm:$0xff]   ;;  %v1926_v20 = vld [vmem:[%s2101_s0 + $0x28] sm:$0xff]  }
   0x8   :  { %1523 = vmatprep.subr.bf16.mxu0 %v1777_v2  ;;  %v1931_v21 = vld [vmem:[%s2101_s0 + $0x30] sm:$0xff]   ;;  %v1938_v22 = vld [vmem:[%s2101_s0 + $0x38] sm:$0xff]   ;;  %v1799_v48 = vld [vmem:[%s2102_s2 + $0x40] sm:$0xff]  }
   0x9   :  { %v1798_v23 = vld [vmem:[%s2102_s2 + $0x38] sm:$0xff]   ;;  %v1800_v49 = vld [vmem:[%s2102_s2 + $0x48] sm:$0xff]   ;;  %v1801_v50 = vld [vmem:[%s2102_s2 + $0x50] sm:$0xff]  }
   0xa   :  { %1554 = vmatpush3.bf16.msra.mxu1 %v1792_v8  ;;  %v1802_v51 = vld [vmem:[%s2102_s2 + $0x58] sm:$0xff]   ;;  %v1803_v52 = vld [vmem:[%s2102_s2 + $0x60] sm:$0xff]   ;;  %v1804_v53 = vld [vmem:[%s2102_s2 + $0x68] sm:$0xff]  }
   0xb   :  { %1524 = vmatpush3.bf16.msra.mxu0 %v1777_v2  ;;  %1555 = vmatprep.subr.bf16.mxu1 %v1793_v10  ;;  %v1805_v54 = vld [vmem:[%s2102_s2 + $0x70] sm:$0xff]   ;;  %v1304_v56 = vld [vmem:[%s2103_s3] ss:$0 sm:$0xff] }
   0xc   :  { %1525 = vmatprep.subr.bf16.mxu0 %v1778_v3 }
   0xe   :  { %1556 = vmatpush3.bf16.msra.mxu1 %v1793_v10 }
   0xf   :  { %1526 = vmatpush3.bf16.msra.mxu0 %v1778_v3  ;;  %1557 = vmatprep.subr.bf16.mxu1 %v1794_v12 }
  0x10   :  { %1527 = vmatprep.subr.bf16.mxu0 %v1779_v5 }
  0x12   :  { %1558 = vmatpush3.bf16.msra.mxu1 %v1794_v12 }
  0x13   :  { %1528 = vmatpush3.bf16.msra.mxu0 %v1779_v5  ;;  %1559 = vmatprep.subr.bf16.mxu1 %v1795_v13 }
  0x14   :  { %1529 = vmatprep.subr.bf16.mxu0 %v1780_v6 }
  0x16   :  { %1560 = vmatpush3.bf16.msra.mxu1 %v1795_v13 }
  0x17   :  { %1530 = vmatpush3.bf16.msra.mxu0 %v1780_v6  ;;  %1561 = vmatprep.subr.bf16.mxu1 %v1796_v16 }
  0x18   :  { %1531 = vmatprep.subr.bf16.mxu0 %v1781_v9 }
  0x1a   :  { %1562 = vmatpush3.bf16.msra.mxu1 %v1796_v16 }
  0x1b   :  { %1532 = vmatpush3.bf16.msra.mxu0 %v1781_v9  ;;  %1563 = vmatprep.subr.bf16.mxu1 %v1797_v17 }
  0x1c   :  { %1533 = vmatprep.subr.bf16.mxu0 %v1782_v11 }
  0x1e   :  { %1564 = vmatpush3.bf16.msra.mxu1 %v1797_v17 }
  0x1f   :  { %1534 = vmatpush3.bf16.msra.mxu0 %v1782_v11  ;;  %1565 = vmatprep.subr.bf16.mxu1 %v1798_v23 }
  0x22   :  { %1536 = vmatmul.mubr.bf16.vlgmr.msra.gmra.mrb[0].mxu0 %v1896_v14  ;;  %1566 = vmatpush3.bf16.msra.mxu1 %v1798_v23 }
  0x23   :  { %1539 = vmatprep.mubr.bf16.mxu0 %v1901_v15  ;;  %1615 = vmatprep.subr.bf16.mxu1 %v1799_v48 }
  0x2a   :  { %1540 = vmatmul.mubr.bf16.gmra.mrb[4].mxu0 %v1914_v18 }
  0x2b   :  { %1543 = vmatprep.mubr.bf16.mxu0 %v1919_v19 }
  0x32   :  { %1544 = vmatmul.mubr.bf16.gmra.mrb[8].mxu0 %v1926_v20 }
  0x33   :  { %1547 = vmatprep.mubr.bf16.mxu0 %v1931_v21 }
  0x3a   :  { %1548 = vmatmul.mubr.bf16.gmra.mrb[12].mxu0 %v1938_v22 }
  0x3b   :  { %1599 = vmatprep.mubr.bf16.mxu0 %v1863_v4 }
  0xf5   :  { %v1537_v24 = vpop.f32.mrb[0].mxu0 }
  0xf6   :  { %v180_v25 = vpop.f32.mrb[1].mxu0 }
  0xf7   :  { %v1538_v26 = vpop.f32.mrb[2].mxu0 }
  0xf8   :  { %v244_v27 = vpack.c.bf16 %v1538_v26, %v1537_v24  ;;  %v183_v28 = vpop.f32.mrb[3].mxu0 }
  0xf9   :  { %v243_v29 = vpack.c.bf16 %v183_v28, %v180_v25 }
  0xfb   :  { %1567 = vmatprep.mubr.bf16.mxu1 %v243_v29 }
  0xfc   :  { %1568 = vmatmul.mubr.bf16.vlgmr.msra.gmra.mrb[0].mxu1 %v244_v27 }
  0xfd   :  { %v1541_v30 = vpop.f32.mrb[4].mxu0  ;;  %1616 = vmatpush3.bf16.msra.mxu1 %v1799_v48 }
  0xfe   :  { %v196_v31 = vpop.f32.mrb[5].mxu0  ;;  %1617 = vmatprep.subr.bf16.mxu1 %v1800_v49 }
  0xff   :  { %v1542_v32 = vpop.f32.mrb[6].mxu0 }
 0x100   :  { %v246_v33 = vpack.c.bf16 %v1542_v32, %v1541_v30  ;;  %v199_v34 = vpop.f32.mrb[7].mxu0 }
 0x101   :  { %v245_v35 = vpack.c.bf16 %v199_v34, %v196_v31  ;;  %1618 = vmatpush3.bf16.msra.mxu1 %v1800_v49 }
 0x102   :  { %1619 = vmatprep.subr.bf16.mxu1 %v1801_v50 }
 0x103   :  { %1571 = vmatprep.mubr.bf16.mxu1 %v245_v35 }
 0x104   :  { %1572 = vmatmul.mubr.bf16.gmra.mrb[4].mxu1 %v246_v33 }
 0x105   :  { %v1545_v36 = vpop.f32.mrb[8].mxu0  ;;  %1620 = vmatpush3.bf16.msra.mxu1 %v1801_v50 }
 0x106   :  { %v212_v37 = vpop.f32.mrb[9].mxu0  ;;  %1621 = vmatprep.subr.bf16.mxu1 %v1802_v51 }
 0x107   :  { %v1546_v38 = vpop.f32.mrb[10].mxu0 }
 0x108   :  { %v248_v39 = vpack.c.bf16 %v1546_v38, %v1545_v36  ;;  %v215_v40 = vpop.f32.mrb[11].mxu0 }
 0x109   :  { %v247_v41 = vpack.c.bf16 %v215_v40, %v212_v37  ;;  %1622 = vmatpush3.bf16.msra.mxu1 %v1802_v51  ;;  %v1806_v40 = vld [vmem:[%s2102_s2 + $0x78] sm:$0xff]  }
 0x10a   :  { %1623 = vmatprep.subr.bf16.mxu1 %v1803_v52 }
 0x10b   :  { %1575 = vmatprep.mubr.bf16.mxu1 %v247_v41 }
 0x10c   :  { %1576 = vmatmul.mubr.bf16.gmra.mrb[8].mxu1 %v248_v39 }
 0x10d   :  { %v1549_v42 = vpop.f32.mrb[12].mxu0  ;;  %1624 = vmatpush3.bf16.msra.mxu1 %v1803_v52 }
 0x10e   :  { %v228_v43 = vpop.f32.mrb[13].mxu0  ;;  %1625 = vmatprep.subr.bf16.mxu1 %v1804_v53 }
 0x10f   :  { %v1550_v44 = vpop.f32.mrb[14].mxu0 }
 0x110   :  { %v250_v45 = vpack.c.bf16 %v1550_v44, %v1549_v42  ;;  %v231_v46 = vpop.f32.mrb[15].mxu0 }
 0x111   :  { %v249_v47 = vpack.c.bf16 %v231_v46, %v228_v43  ;;  %1626 = vmatpush3.bf16.msra.mxu1 %v1804_v53 }
 0x112   :  { %1627 = vmatprep.subr.bf16.mxu1 %v1805_v54 }
 0x113   :  { %1579 = vmatprep.mubr.bf16.mxu1 %v249_v47 }
 0x114   :  { %1580 = vmatmul.mubr.bf16.gmra.mrb[12].mxu1 %v250_v45 }
 0x115   :  { %1628 = vmatpush3.bf16.msra.mxu1 %v1805_v54 }
 0x116   :  { %1629 = vmatprep.subr.bf16.mxu1 %v1806_v40 }
 0x119   :  { %1630 = vmatpush3.bf16.msra.mxu1 %v1806_v40 }
 0x1cf   :  { %v1569_v55 = vpop.f32.mrb[0].mxu1 }
 0x1d0   :  { %v356_v57 = vpop.f32.mrb[1].mxu1  ;;  %v365_v59 = vadd.f32 %v1569_v55, %v1304_v56 }
 0x1d1   :  { %v1570_v58 = vpop.f32.mrb[2].mxu1  ;;  %v357_v62 = vadd.f32 %v1304_v56, %v356_v57 }
 0x1d2   :  { %v368_v60 = vadd.f32 %v1570_v58, %v1304_v56  ;;  %v359_v61 = vpop.f32.mrb[3].mxu1 }
 0x1d3   :  { %v360_v63 = vadd.f32 %v1304_v56, %v359_v61 }
 0x1d4   :  { %v420_v0 = vpack.c.bf16 %v368_v60, %v365_v59 }
 0x1d5   :  { %v419_v1 = vpack.c.bf16 %v360_v63, %v357_v62 }
 0x1d7   :  { %v1573_v2 = vpop.f32.mrb[4].mxu1  ;;  %1583 = vmatprep.subr.bf16.mxu0 %v419_v1 }
 0x1d8   :  { %v372_v3 = vpop.f32.mrb[5].mxu1  ;;  %1584 = vmatpush3.bf16.msra.mxu0 %v419_v1  ;;  %v381_v6 = vadd.f32 %v1573_v2, %v1304_v56  ;;  %v1807_v1 = vld [vmem:[%s2102_s2 + $0x80] sm:$0xff]   ;;  %v1808_v2 = vld [vmem:[%s2102_s2 + $0x88] sm:$0xff]  }
 0x1d9   :  { %v1574_v5 = vpop.f32.mrb[6].mxu1  ;;  %1585 = vmatprep.subr.bf16.mxu0 %v420_v0  ;;  %v373_v9 = vadd.f32 %v1304_v56, %v372_v3  ;;  %1679 = vmatprep.subr.bf16.mxu1 %v1807_v1  ;;  %v1809_v3 = vld [vmem:[%s2102_s2 + $0x90] sm:$0xff]  }
 0x1da   :  { %v384_v7 = vadd.f32 %v1574_v5, %v1304_v56  ;;  %v375_v8 = vpop.f32.mrb[7].mxu1  ;;  %v1810_v5 = vld [vmem:[%s2102_s2 + $0x98] sm:$0xff]  }
 0x1db   :  { %v376_v10 = vadd.f32 %v1304_v56, %v375_v8  ;;  %v1813_v8 = vld [vmem:[%s2102_s2 + $0xb0] sm:$0xff]  }
 0x1dc   :  { %v422_v11 = vpack.c.bf16 %v384_v7, %v381_v6  ;;  %1586 = vmatpush3.bf16.msra.mxu0 %v420_v0  ;;  %v1811_v6 = vld [vmem:[%s2102_s2 + $0xa0] sm:$0xff]   ;;  %v1812_v7 = vld [vmem:[%s2102_s2 + $0xa8] sm:$0xff]  }
 0x1dd   :  { %v421_v12 = vpack.c.bf16 %v376_v10, %v373_v9  ;;  %v1330_v10 = vld [vmem:[%s2103_s3 + $0x1] ss:$0 sm:$0xff] }
 0x1df   :  { %v1577_v13 = vpop.f32.mrb[8].mxu1  ;;  %1587 = vmatprep.subr.bf16.mxu0 %v421_v12 }
 0x1e0   :  { %v388_v16 = vpop.f32.mrb[9].mxu1  ;;  %1588 = vmatpush3.bf16.msra.mxu0 %v421_v12  ;;  %v397_v23 = vadd.f32 %v1577_v13, %v1304_v56 }
 0x1e1   :  { %v1578_v17 = vpop.f32.mrb[10].mxu1  ;;  %1589 = vmatprep.subr.bf16.mxu0 %v422_v11  ;;  %v389_v26 = vadd.f32 %v1304_v56, %v388_v16 }
 0x1e2   :  { %v400_v24 = vadd.f32 %v1578_v17, %v1304_v56  ;;  %v391_v25 = vpop.f32.mrb[11].mxu1 }
 0x1e3   :  { %v392_v27 = vadd.f32 %v1304_v56, %v391_v25 }
 0x1e4   :  { %v424_v28 = vpack.c.bf16 %v400_v24, %v397_v23  ;;  %1590 = vmatpush3.bf16.msra.mxu0 %v422_v11 }
 0x1e5   :  { %v423_v29 = vpack.c.bf16 %v392_v27, %v389_v26 }
 0x1e7   :  { %v1581_v30 = vpop.f32.mrb[12].mxu1  ;;  %1591 = vmatprep.subr.bf16.mxu0 %v423_v29 }
 0x1e8   :  { %v404_v31 = vpop.f32.mrb[13].mxu1  ;;  %1592 = vmatpush3.bf16.msra.mxu0 %v423_v29  ;;  %v413_v33 = vadd.f32 %v1581_v30, %v1304_v56 }
 0x1e9   :  { %v1582_v32 = vpop.f32.mrb[14].mxu1  ;;  %1593 = vmatprep.subr.bf16.mxu0 %v424_v28  ;;  %v405_v36 = vadd.f32 %v1304_v56, %v404_v31 }
 0x1ea   :  { %v416_v34 = vadd.f32 %v1582_v32, %v1304_v56  ;;  %v407_v35 = vpop.f32.mrb[15].mxu1 }
 0x1eb   :  { %v408_v37 = vadd.f32 %v1304_v56, %v407_v35 }
 0x1ec   :  { %v426_v38 = vpack.c.bf16 %v416_v34, %v413_v33  ;;  %1594 = vmatpush3.bf16.msra.mxu0 %v424_v28 }
 0x1ed   :  { %v425_v39 = vpack.c.bf16 %v408_v37, %v405_v36 }
 0x1ef   :  { %1595 = vmatprep.subr.bf16.mxu0 %v425_v39 }
 0x1f0   :  { %1596 = vmatpush3.bf16.msra.mxu0 %v425_v39 }
 0x1f1   :  { %1597 = vmatprep.subr.bf16.mxu0 %v426_v38 }
 0x1f4   :  { %1598 = vmatpush3.bf16.msra.mxu0 %v426_v38 }
 0x1f7   :  { %1600 = vmatmul.mubr.bf16.vlgmr.msra.gmra.mrb[16].mxu0 %v1896_v14 }
 0x1f8   :  { %1603 = vmatprep.mubr.bf16.mxu0 %v1901_v15 }
 0x1ff   :  { %1604 = vmatmul.mubr.bf16.gmra.mrb[20].mxu0 %v1914_v18 }
 0x200   :  { %1607 = vmatprep.mubr.bf16.mxu0 %v1919_v19 }
 0x207   :  { %1608 = vmatmul.mubr.bf16.gmra.mrb[24].mxu0 %v1926_v20 }
 0x208   :  { %1611 = vmatprep.mubr.bf16.mxu0 %v1931_v21 }
 0x20f   :  { %1612 = vmatmul.mubr.bf16.gmra.mrb[28].mxu0 %v1938_v22 }
 0x210   :  { %1663 = vmatprep.mubr.bf16.mxu0 %v1863_v4 }
 0x2ca   :  { %v1601_v41 = vpop.f32.mrb[16].mxu0 }
 0x2cb   :  { %v461_v42 = vpop.f32.mrb[17].mxu0 }
 0x2cc   :  { %v1602_v43 = vpop.f32.mrb[18].mxu0 }
 0x2cd   :  { %v525_v44 = vpack.c.bf16 %v1602_v43, %v1601_v41  ;;  %v464_v45 = vpop.f32.mrb[19].mxu0 }
 0x2ce   :  { %v524_v46 = vpack.c.bf16 %v464_v45, %v461_v42 }
 0x2d0   :  { %1631 = vmatprep.mubr.bf16.mxu1 %v524_v46 }
 0x2d1   :  { %1632 = vmatmul.mubr.bf16.vlgmr.msra.gmra.mrb[16].mxu1 %v525_v44 }
 0x2d2   :  { %v1605_v47 = vpop.f32.mrb[20].mxu0  ;;  %1680 = vmatpush3.bf16.msra.mxu1 %v1807_v1 }
 0x2d3   :  { %v477_v48 = vpop.f32.mrb[21].mxu0  ;;  %1681 = vmatprep.subr.bf16.mxu1 %v1808_v2 }
 0x2d4   :  { %v1606_v49 = vpop.f32.mrb[22].mxu0 }
 0x2d5   :  { %v527_v50 = vpack.c.bf16 %v1606_v49, %v1605_v47  ;;  %v480_v51 = vpop.f32.mrb[23].mxu0 }
 0x2d6   :  { %v526_v52 = vpack.c.bf16 %v480_v51, %v477_v48  ;;  %1682 = vmatpush3.bf16.msra.mxu1 %v1808_v2 }
 0x2d7   :  { %1683 = vmatprep.subr.bf16.mxu1 %v1809_v3 }
 0x2d8   :  { %1635 = vmatprep.mubr.bf16.mxu1 %v526_v52 }
 0x2d9   :  { %1636 = vmatmul.mubr.bf16.gmra.mrb[20].mxu1 %v527_v50 }
 0x2da   :  { %v1609_v53 = vpop.f32.mrb[24].mxu0  ;;  %1684 = vmatpush3.bf16.msra.mxu1 %v1809_v3 }
 0x2db   :  { %v493_v54 = vpop.f32.mrb[25].mxu0  ;;  %1685 = vmatprep.subr.bf16.mxu1 %v1810_v5 }
 0x2dc   :  { %v1610_v55 = vpop.f32.mrb[26].mxu0 }
 0x2dd   :  { %v529_v56 = vpack.c.bf16 %v1610_v55, %v1609_v53  ;;  %v496_v57 = vpop.f32.mrb[27].mxu0 }
 0x2de   :  { %v528_v58 = vpack.c.bf16 %v496_v57, %v493_v54  ;;  %1686 = vmatpush3.bf16.msra.mxu1 %v1810_v5  ;;  %v1814_v57 = vld [vmem:[%s2102_s2 + $0xb8] sm:$0xff]  }
 0x2df   :  { %1687 = vmatprep.subr.bf16.mxu1 %v1811_v6 }
 0x2e0   :  { %1639 = vmatprep.mubr.bf16.mxu1 %v528_v58 }
 0x2e1   :  { %1640 = vmatmul.mubr.bf16.gmra.mrb[24].mxu1 %v529_v56 }
 0x2e2   :  { %v1613_v59 = vpop.f32.mrb[28].mxu0  ;;  %1688 = vmatpush3.bf16.msra.mxu1 %v1811_v6 }
 0x2e3   :  { %v509_v60 = vpop.f32.mrb[29].mxu0  ;;  %1689 = vmatprep.subr.bf16.mxu1 %v1812_v7 }
 0x2e4   :  { %v1614_v61 = vpop.f32.mrb[30].mxu0 }
 0x2e5   :  { %v531_v62 = vpack.c.bf16 %v1614_v61, %v1613_v59  ;;  %v512_v63 = vpop.f32.mrb[31].mxu0 }
 0x2e6   :  { %v530_v0 = vpack.c.bf16 %v512_v63, %v509_v60  ;;  %1690 = vmatpush3.bf16.msra.mxu1 %v1812_v7 }
 0x2e7   :  { %1691 = vmatprep.subr.bf16.mxu1 %v1813_v8 }
 0x2e8   :  { %1643 = vmatprep.mubr.bf16.mxu1 %v530_v0 }
 0x2e9   :  { %1644 = vmatmul.mubr.bf16.gmra.mrb[28].mxu1 %v531_v62 }
 0x2ea   :  { %1692 = vmatpush3.bf16.msra.mxu1 %v1813_v8 }
 0x2eb   :  { %1693 = vmatprep.subr.bf16.mxu1 %v1814_v57 }
 0x2ee   :  { %1694 = vmatpush3.bf16.msra.mxu1 %v1814_v57 }
 0x3a4   :  { %v1633_v9 = vpop.f32.mrb[16].mxu1 }
 0x3a5   :  { %v639_v11 = vpop.f32.mrb[17].mxu1  ;;  %v648_v13 = vadd.f32 %v1633_v9, %v1330_v10 }
 0x3a6   :  { %v1634_v12 = vpop.f32.mrb[18].mxu1  ;;  %v640_v23 = vadd.f32 %v1330_v10, %v639_v11 }
 0x3a7   :  { %v651_v16 = vadd.f32 %v1634_v12, %v1330_v10  ;;  %v642_v17 = vpop.f32.mrb[19].mxu1 }
 0x3a8   :  { %v643_v24 = vadd.f32 %v1330_v10, %v642_v17 }
 0x3a9   :  { %v703_v25 = vpack.c.bf16 %v651_v16, %v648_v13 }
 0x3aa   :  { %v702_v26 = vpack.c.bf16 %v643_v24, %v640_v23 }
 0x3ac   :  { %v1637_v27 = vpop.f32.mrb[20].mxu1  ;;  %1647 = vmatprep.subr.bf16.mxu0 %v702_v26 }
 0x3ad   :  { %v655_v28 = vpop.f32.mrb[21].mxu1  ;;  %1648 = vmatpush3.bf16.msra.mxu0 %v702_v26  ;;  %v664_v30 = vadd.f32 %v1637_v27, %v1330_v10  ;;  %v1816_v26 = vld [vmem:[%s2102_s2 + $0xc8] sm:$0xff]   ;;  %v1817_v27 = vld [vmem:[%s2102_s2 + $0xd0] sm:$0xff]  }
 0x3ae   :  { %v1638_v29 = vpop.f32.mrb[22].mxu1  ;;  %1649 = vmatprep.subr.bf16.mxu0 %v703_v25  ;;  %v656_v33 = vadd.f32 %v1330_v10, %v655_v28  ;;  %v1818_v28 = vld [vmem:[%s2102_s2 + $0xd8] sm:$0xff]  }
 0x3af   :  { %v667_v31 = vadd.f32 %v1638_v29, %v1330_v10  ;;  %v658_v32 = vpop.f32.mrb[23].mxu1  ;;  %v1819_v29 = vld [vmem:[%s2102_s2 + $0xe0] sm:$0xff]  }
 0x3b0   :  { %v659_v34 = vadd.f32 %v1330_v10, %v658_v32 }
 0x3b1   :  { %v705_v35 = vpack.c.bf16 %v667_v31, %v664_v30  ;;  %1650 = vmatpush3.bf16.msra.mxu0 %v703_v25  ;;  %v1815_v25 = vld [vmem:[%s2102_s2 + $0xc0] sm:$0xff]   ;;  %v1820_v30 = vld [vmem:[%s2102_s2 + $0xe8] sm:$0xff]   ;;  %v1821_v31 = vld [vmem:[%s2102_s2 + $0xf0] sm:$0xff]  }
 0x3b2   :  { %v704_v36 = vpack.c.bf16 %v659_v34, %v656_v33  ;;  %1743 = vmatprep.subr.bf16.mxu1 %v1815_v25  ;;  %v1356_v33 = vld [vmem:[%s2103_s3 + $0x2] ss:$0 sm:$0xff] }
 0x3b4   :  { %v1641_v37 = vpop.f32.mrb[24].mxu1  ;;  %1651 = vmatprep.subr.bf16.mxu0 %v704_v36 }
 0x3b5   :  { %v671_v38 = vpop.f32.mrb[25].mxu1  ;;  %1652 = vmatpush3.bf16.msra.mxu0 %v704_v36  ;;  %v680_v40 = vadd.f32 %v1641_v37, %v1330_v10 }
 0x3b6   :  { %v1642_v39 = vpop.f32.mrb[26].mxu1  ;;  %1653 = vmatprep.subr.bf16.mxu0 %v705_v35  ;;  %v672_v43 = vadd.f32 %v1330_v10, %v671_v38 }
 0x3b7   :  { %v683_v41 = vadd.f32 %v1642_v39, %v1330_v10  ;;  %v674_v42 = vpop.f32.mrb[27].mxu1 }
 0x3b8   :  { %v675_v44 = vadd.f32 %v1330_v10, %v674_v42 }
 0x3b9   :  { %v707_v45 = vpack.c.bf16 %v683_v41, %v680_v40  ;;  %1654 = vmatpush3.bf16.msra.mxu0 %v705_v35 }
 0x3ba   :  { %v706_v46 = vpack.c.bf16 %v675_v44, %v672_v43 }
 0x3bc   :  { %v1645_v47 = vpop.f32.mrb[28].mxu1  ;;  %1655 = vmatprep.subr.bf16.mxu0 %v706_v46 }
 0x3bd   :  { %v687_v48 = vpop.f32.mrb[29].mxu1  ;;  %1656 = vmatpush3.bf16.msra.mxu0 %v706_v46  ;;  %v696_v50 = vadd.f32 %v1645_v47, %v1330_v10 }
 0x3be   :  { %v1646_v49 = vpop.f32.mrb[30].mxu1  ;;  %1657 = vmatprep.subr.bf16.mxu0 %v707_v45  ;;  %v688_v53 = vadd.f32 %v1330_v10, %v687_v48 }
 0x3bf   :  { %v699_v51 = vadd.f32 %v1646_v49, %v1330_v10  ;;  %v690_v52 = vpop.f32.mrb[31].mxu1 }
 0x3c0   :  { %v691_v54 = vadd.f32 %v1330_v10, %v690_v52 }
 0x3c1   :  { %v709_v55 = vpack.c.bf16 %v699_v51, %v696_v50  ;;  %1658 = vmatpush3.bf16.msra.mxu0 %v707_v45 }
 0x3c2   :  { %v708_v56 = vpack.c.bf16 %v691_v54, %v688_v53 }
 0x3c4   :  { %1659 = vmatprep.subr.bf16.mxu0 %v708_v56 }
 0x3c5   :  { %1660 = vmatpush3.bf16.msra.mxu0 %v708_v56 }
 0x3c6   :  { %1661 = vmatprep.subr.bf16.mxu0 %v709_v55 }
 0x3c9   :  { %1662 = vmatpush3.bf16.msra.mxu0 %v709_v55 }
 0x3cc   :  { %1664 = vmatmul.mubr.bf16.vlgmr.msra.gmra.mrb[32].mxu0 %v1896_v14 }
 0x3cd   :  { %1667 = vmatprep.mubr.bf16.mxu0 %v1901_v15 }
 0x3d4   :  { %1668 = vmatmul.mubr.bf16.gmra.mrb[36].mxu0 %v1914_v18 }
 0x3d5   :  { %1671 = vmatprep.mubr.bf16.mxu0 %v1919_v19 }
 0x3dc   :  { %1672 = vmatmul.mubr.bf16.gmra.mrb[40].mxu0 %v1926_v20 }
 0x3dd   :  { %1675 = vmatprep.mubr.bf16.mxu0 %v1931_v21 }
 0x3e4   :  { %1676 = vmatmul.mubr.bf16.gmra.mrb[44].mxu0 %v1938_v22 }
 0x3e5   :  { %1727 = vmatprep.mubr.bf16.mxu0 %v1863_v4 }
 0x49f   :  { %v1665_v58 = vpop.f32.mrb[32].mxu0 }
 0x4a0   :  { %v744_v59 = vpop.f32.mrb[33].mxu0 }
 0x4a1   :  { %v1666_v60 = vpop.f32.mrb[34].mxu0 }
 0x4a2   :  { %v808_v61 = vpack.c.bf16 %v1666_v60, %v1665_v58  ;;  %v747_v62 = vpop.f32.mrb[35].mxu0 }
 0x4a3   :  { %v807_v63 = vpack.c.bf16 %v747_v62, %v744_v59 }
 0x4a5   :  { %1695 = vmatprep.mubr.bf16.mxu1 %v807_v63 }
 0x4a6   :  { %1696 = vmatmul.mubr.bf16.vlgmr.msra.gmra.mrb[32].mxu1 %v808_v61 }
 0x4a7   :  { %v1669_v0 = vpop.f32.mrb[36].mxu0  ;;  %1744 = vmatpush3.bf16.msra.mxu1 %v1815_v25 }
 0x4a8   :  { %v760_v1 = vpop.f32.mrb[37].mxu0  ;;  %1745 = vmatprep.subr.bf16.mxu1 %v1816_v26 }
 0x4a9   :  { %v1670_v2 = vpop.f32.mrb[38].mxu0 }
 0x4aa   :  { %v810_v3 = vpack.c.bf16 %v1670_v2, %v1669_v0  ;;  %v763_v5 = vpop.f32.mrb[39].mxu0 }
 0x4ab   :  { %v809_v4 = vpack.c.bf16 %v763_v5, %v760_v1  ;;  %1746 = vmatpush3.bf16.msra.mxu1 %v1816_v26 }
 0x4ac   :  { %1747 = vmatprep.subr.bf16.mxu1 %v1817_v27 }
 0x4ad   :  { %1699 = vmatprep.mubr.bf16.mxu1 %v809_v4 }
 0x4ae   :  { %1700 = vmatmul.mubr.bf16.gmra.mrb[36].mxu1 %v810_v3 }
 0x4af   :  { %v1673_v6 = vpop.f32.mrb[40].mxu0  ;;  %1748 = vmatpush3.bf16.msra.mxu1 %v1817_v27 }
 0x4b0   :  { %v776_v7 = vpop.f32.mrb[41].mxu0  ;;  %1749 = vmatprep.subr.bf16.mxu1 %v1818_v28 }
 0x4b1   :  { %v1674_v8 = vpop.f32.mrb[42].mxu0 }
 0x4b2   :  { %v812_v9 = vpack.c.bf16 %v1674_v8, %v1673_v6  ;;  %v779_v10 = vpop.f32.mrb[43].mxu0 }
 0x4b3   :  { %v811_v11 = vpack.c.bf16 %v779_v10, %v776_v7  ;;  %1750 = vmatpush3.bf16.msra.mxu1 %v1818_v28 }
 0x4b4   :  { %1751 = vmatprep.subr.bf16.mxu1 %v1819_v29 }
 0x4b5   :  { %1703 = vmatprep.mubr.bf16.mxu1 %v811_v11 }
 0x4b6   :  { %1704 = vmatmul.mubr.bf16.gmra.mrb[40].mxu1 %v812_v9  ;;  %v1822_v9 = vld [vmem:[%s2102_s2 + $0xf8] sm:$0xff]  }
 0x4b7   :  { %v1677_v12 = vpop.f32.mrb[44].mxu0  ;;  %1752 = vmatpush3.bf16.msra.mxu1 %v1819_v29 }
 0x4b8   :  { %v792_v13 = vpop.f32.mrb[45].mxu0  ;;  %1753 = vmatprep.subr.bf16.mxu1 %v1820_v30 }
 0x4b9   :  { %v1678_v16 = vpop.f32.mrb[46].mxu0 }
 0x4ba   :  { %v814_v17 = vpack.c.bf16 %v1678_v16, %v1677_v12  ;;  %v795_v23 = vpop.f32.mrb[47].mxu0 }
 0x4bb   :  { %v813_v24 = vpack.c.bf16 %v795_v23, %v792_v13  ;;  %1754 = vmatpush3.bf16.msra.mxu1 %v1820_v30 }
 0x4bc   :  { %1755 = vmatprep.subr.bf16.mxu1 %v1821_v31 }
 0x4bd   :  { %1707 = vmatprep.mubr.bf16.mxu1 %v813_v24 }
 0x4be   :  { %1708 = vmatmul.mubr.bf16.gmra.mrb[44].mxu1 %v814_v17 }
 0x4bf   :  { %1756 = vmatpush3.bf16.msra.mxu1 %v1821_v31 }
 0x4c0   :  { %1757 = vmatprep.subr.bf16.mxu1 %v1822_v9 }
 0x4c3   :  { %1758 = vmatpush3.bf16.msra.mxu1 %v1822_v9 }
 0x579   :  { %v1697_v32 = vpop.f32.mrb[32].mxu1 }
 0x57a   :  { %v922_v34 = vpop.f32.mrb[33].mxu1  ;;  %v931_v36 = vadd.f32 %v1697_v32, %v1356_v33 }
 0x57b   :  { %v1698_v35 = vpop.f32.mrb[34].mxu1  ;;  %v923_v39 = vadd.f32 %v1356_v33, %v922_v34  ;;  %v1382_v34 = vld [vmem:[%s2103_s3 + $0x3] ss:$0 sm:$0xff] }
 0x57c   :  { %v934_v37 = vadd.f32 %v1698_v35, %v1356_v33  ;;  %v925_v38 = vpop.f32.mrb[35].mxu1 }
 0x57d   :  { %v926_v40 = vadd.f32 %v1356_v33, %v925_v38 }
 0x57e   :  { %v986_v41 = vpack.c.bf16 %v934_v37, %v931_v36 }
 0x57f   :  { %v985_v42 = vpack.c.bf16 %v926_v40, %v923_v39 }
 0x581   :  { %v1701_v43 = vpop.f32.mrb[36].mxu1  ;;  %1711 = vmatprep.subr.bf16.mxu0 %v985_v42 }
 0x582   :  { %v938_v44 = vpop.f32.mrb[37].mxu1  ;;  %1712 = vmatpush3.bf16.msra.mxu0 %v985_v42  ;;  %v947_v46 = vadd.f32 %v1701_v43, %v1356_v33 }
 0x583   :  { %v1702_v45 = vpop.f32.mrb[38].mxu1  ;;  %1713 = vmatprep.subr.bf16.mxu0 %v986_v41  ;;  %v939_v49 = vadd.f32 %v1356_v33, %v938_v44 }
 0x584   :  { %v950_v47 = vadd.f32 %v1702_v45, %v1356_v33  ;;  %v941_v48 = vpop.f32.mrb[39].mxu1 }
 0x585   :  { %v942_v50 = vadd.f32 %v1356_v33, %v941_v48 }
 0x586   :  { %v988_v51 = vpack.c.bf16 %v950_v47, %v947_v46  ;;  %1714 = vmatpush3.bf16.msra.mxu0 %v986_v41 }
 0x587   :  { %v987_v52 = vpack.c.bf16 %v942_v50, %v939_v49 }
 0x589   :  { %v1705_v53 = vpop.f32.mrb[40].mxu1  ;;  %1715 = vmatprep.subr.bf16.mxu0 %v987_v52 }
 0x58a   :  { %v954_v54 = vpop.f32.mrb[41].mxu1  ;;  %1716 = vmatpush3.bf16.msra.mxu0 %v987_v52  ;;  %v963_v56 = vadd.f32 %v1705_v53, %v1356_v33 }
 0x58b   :  { %v1706_v55 = vpop.f32.mrb[42].mxu1  ;;  %1717 = vmatprep.subr.bf16.mxu0 %v988_v51  ;;  %v955_v59 = vadd.f32 %v1356_v33, %v954_v54 }
 0x58c   :  { %v966_v57 = vadd.f32 %v1706_v55, %v1356_v33  ;;  %v957_v58 = vpop.f32.mrb[43].mxu1 }
 0x58d   :  { %v958_v60 = vadd.f32 %v1356_v33, %v957_v58 }
 0x58e   :  { %v990_v61 = vpack.c.bf16 %v966_v57, %v963_v56  ;;  %1718 = vmatpush3.bf16.msra.mxu0 %v988_v51 }
 0x58f   :  { %v989_v62 = vpack.c.bf16 %v958_v60, %v955_v59 }
 0x591   :  { %v1709_v63 = vpop.f32.mrb[44].mxu1  ;;  %1719 = vmatprep.subr.bf16.mxu0 %v989_v62 }
 0x592   :  { %v970_v0 = vpop.f32.mrb[45].mxu1  ;;  %1720 = vmatpush3.bf16.msra.mxu0 %v989_v62  ;;  %v979_v2 = vadd.f32 %v1709_v63, %v1356_v33 }
 0x593   :  { %v1710_v1 = vpop.f32.mrb[46].mxu1  ;;  %1721 = vmatprep.subr.bf16.mxu0 %v990_v61  ;;  %v971_v4 = vadd.f32 %v1356_v33, %v970_v0 }
 0x594   :  { %v982_v3 = vadd.f32 %v1710_v1, %v1356_v33  ;;  %v973_v5 = vpop.f32.mrb[47].mxu1 }
 0x595   :  { %v974_v6 = vadd.f32 %v1356_v33, %v973_v5 }
 0x596   :  { %v992_v7 = vpack.c.bf16 %v982_v3, %v979_v2  ;;  %1722 = vmatpush3.bf16.msra.mxu0 %v990_v61 }
 0x597   :  { %v991_v8 = vpack.c.bf16 %v974_v6, %v971_v4 }
 0x599   :  { %1723 = vmatprep.subr.bf16.mxu0 %v991_v8 }
 0x59a   :  { %1724 = vmatpush3.bf16.msra.mxu0 %v991_v8 }
 0x59b   :  { %1725 = vmatprep.subr.bf16.mxu0 %v992_v7 }
 0x59e   :  { %1726 = vmatpush3.bf16.msra.mxu0 %v992_v7 }
 0x5a1   :  { %1728 = vmatmul.mubr.bf16.vlgmr.msra.gmra.mrb[48].mxu0 %v1896_v14 }
 0x5a2   :  { %1731 = vmatprep.mubr.bf16.mxu0 %v1901_v15 }
 0x5a9   :  { %1732 = vmatmul.mubr.bf16.gmra.mrb[52].mxu0 %v1914_v18 }
 0x5aa   :  { %1735 = vmatprep.mubr.bf16.mxu0 %v1919_v19 }
 0x5b1   :  { %1736 = vmatmul.mubr.bf16.gmra.mrb[56].mxu0 %v1926_v20 }
 0x5b2   :  { %1739 = vmatprep.mubr.bf16.mxu0 %v1931_v21 }
 0x5b9   :  { %1740 = vmatmul.mubr.bf16.gmra.mrb[60].mxu0 %v1938_v22 }
 0x674   :  { %v1729_v10 = vpop.f32.mrb[48].mxu0 }
 0x675   :  { %v1027_v14 = vpop.f32.mrb[49].mxu0 }
 0x676   :  { %v1730_v11 = vpop.f32.mrb[50].mxu0 }
 0x677   :  { %v1091_v15 = vpack.c.bf16 %v1730_v11, %v1729_v10  ;;  %v1030_v12 = vpop.f32.mrb[51].mxu0 }
 0x678   :  { %v1090_v18 = vpack.c.bf16 %v1030_v12, %v1027_v14 }
 0x67a   :  { %1759 = vmatprep.mubr.bf16.mxu1 %v1090_v18 }
 0x67b   :  { %1760 = vmatmul.mubr.bf16.vlgmr.msra.gmra.mrb[48].mxu1 %v1091_v15 }
 0x67c   :  { %v1733_v19 = vpop.f32.mrb[52].mxu0 }
 0x67d   :  { %v1043_v20 = vpop.f32.mrb[53].mxu0 }
 0x67e   :  { %v1734_v13 = vpop.f32.mrb[54].mxu0 }
 0x67f   :  { %v1093_v21 = vpack.c.bf16 %v1734_v13, %v1733_v19  ;;  %v1046_v16 = vpop.f32.mrb[55].mxu0 }
 0x680   :  { %v1092_v22 = vpack.c.bf16 %v1046_v16, %v1043_v20 }
 0x682   :  { %1763 = vmatprep.mubr.bf16.mxu1 %v1092_v22 }
 0x683   :  { %1764 = vmatmul.mubr.bf16.gmra.mrb[52].mxu1 %v1093_v21 }
 0x684   :  { %v1737_v17 = vpop.f32.mrb[56].mxu0 }
 0x685   :  { %v1059_v23 = vpop.f32.mrb[57].mxu0 }
 0x686   :  { %v1738_v24 = vpop.f32.mrb[58].mxu0 }
 0x687   :  { %v1095_v25 = vpack.c.bf16 %v1738_v24, %v1737_v17  ;;  %v1062_v26 = vpop.f32.mrb[59].mxu0 }
 0x688   :  { %v1094_v27 = vpack.c.bf16 %v1062_v26, %v1059_v23 }
 0x68a   :  { %1767 = vmatprep.mubr.bf16.mxu1 %v1094_v27 }
 0x68b   :  { %1768 = vmatmul.mubr.bf16.gmra.mrb[56].mxu1 %v1095_v25 }
 0x68c   :  { %v1741_v28 = vpop.f32.mrb[60].mxu0 }
 0x68d   :  { %v1075_v29 = vpop.f32.mrb[61].mxu0 }
 0x68e   :  { %v1742_v30 = vpop.f32.mrb[62].mxu0 }
 0x68f   :  { %v1097_v31 = vpack.c.bf16 %v1742_v30, %v1741_v28  ;;  %v1078_v32 = vpop.f32.mrb[63].mxu0 }
 0x690   :  { %v1096_v33 = vpack.c.bf16 %v1078_v32, %v1075_v29 }
 0x692   :  { %1771 = vmatprep.mubr.bf16.mxu1 %v1096_v33 }
 0x693   :  { %1772 = vmatmul.mubr.bf16.gmra.mrb[60].mxu1 %v1097_v31 }
 0x74e   :  { %v1761_v35 = vpop.f32.mrb[48].mxu1 }
 0x74f   :  { %v1214_v36 = vadd.f32 %v1761_v35, %v1382_v34  ;;  %v1205_v37 = vpop.f32.mrb[49].mxu1 }
 0x750   :  { %v1206_v38 = vadd.f32 %v1382_v34, %v1205_v37  ;;  %v1762_v39 = vpop.f32.mrb[50].mxu1 }
 0x751   :  { %1270 = vst [vmem:[%s2104_s4 + $0x10] sm:$0xff] %v1214_v36  ;;  %v1217_v40 = vadd.f32 %v1762_v39, %v1382_v34  ;;  %v1208_v41 = vpop.f32.mrb[51].mxu1 }
 0x752   :  { %1268 = vst [vmem:[%s2104_s4] sm:$0xff] %v1206_v38  ;;  %v1209_v42 = vadd.f32 %v1382_v34, %v1208_v41 }
 0x753   :  { %1271 = vst [vmem:[%s2104_s4 + $0x18] sm:$0xff] %v1217_v40 }
 0x754   :  { %1269 = vst [vmem:[%s2104_s4 + $0x8] sm:$0xff] %v1209_v42 }
 0x756   :  { %v1765_v43 = vpop.f32.mrb[52].mxu1 }
 0x757   :  { %v1230_v44 = vadd.f32 %v1765_v43, %v1382_v34  ;;  %v1221_v45 = vpop.f32.mrb[53].mxu1 }
 0x758   :  { %v1222_v46 = vadd.f32 %v1382_v34, %v1221_v45  ;;  %v1766_v47 = vpop.f32.mrb[54].mxu1 }
 0x759   :  { %1274 = vst [vmem:[%s2104_s4 + $0x30] sm:$0xff] %v1230_v44  ;;  %v1233_v48 = vadd.f32 %v1766_v47, %v1382_v34  ;;  %v1224_v49 = vpop.f32.mrb[55].mxu1 }
 0x75a   :  { %1272 = vst [vmem:[%s2104_s4 + $0x20] sm:$0xff] %v1222_v46  ;;  %v1225_v50 = vadd.f32 %v1382_v34, %v1224_v49 }
 0x75b   :  { %1275 = vst [vmem:[%s2104_s4 + $0x38] sm:$0xff] %v1233_v48 }
 0x75c   :  { %1273 = vst [vmem:[%s2104_s4 + $0x28] sm:$0xff] %v1225_v50 }
 0x75e   :  { %v1769_v51 = vpop.f32.mrb[56].mxu1 }
 0x75f   :  { %v1246_v52 = vadd.f32 %v1769_v51, %v1382_v34  ;;  %v1237_v53 = vpop.f32.mrb[57].mxu1 }
 0x760   :  { %v1238_v54 = vadd.f32 %v1382_v34, %v1237_v53  ;;  %v1770_v55 = vpop.f32.mrb[58].mxu1 }
 0x761   :  { %1278 = vst [vmem:[%s2104_s4 + $0x50] sm:$0xff] %v1246_v52  ;;  %v1249_v56 = vadd.f32 %v1770_v55, %v1382_v34  ;;  %v1240_v57 = vpop.f32.mrb[59].mxu1 }
 0x762   :  { %1276 = vst [vmem:[%s2104_s4 + $0x40] sm:$0xff] %v1238_v54  ;;  %v1241_v58 = vadd.f32 %v1382_v34, %v1240_v57 }
 0x763   :  { %1279 = vst [vmem:[%s2104_s4 + $0x58] sm:$0xff] %v1249_v56 }
 0x764   :  { %1277 = vst [vmem:[%s2104_s4 + $0x48] sm:$0xff] %v1241_v58 }
 0x766   :  { %v1773_v59 = vpop.f32.mrb[60].mxu1 }
 0x767   :  { %v1262_v60 = vadd.f32 %v1773_v59, %v1382_v34  ;;  %v1253_v61 = vpop.f32.mrb[61].mxu1 }
 0x768   :  { %v1254_v62 = vadd.f32 %v1382_v34, %v1253_v61  ;;  %v1774_v63 = vpop.f32.mrb[62].mxu1 }
 0x769   :  { %1282 = vst [vmem:[%s2104_s4 + $0x70] sm:$0xff] %v1262_v60  ;;  %v1265_v0 = vadd.f32 %v1774_v63, %v1382_v34  ;;  %v1256_v1 = vpop.f32.mrb[63].mxu1 }
 0x76a   :  { %1280 = vst [vmem:[%s2104_s4 + $0x60] sm:$0xff] %v1254_v62  ;;  %v1257_v2 = vadd.f32 %v1382_v34, %v1256_v1 }
 0x76b   :  { %1283 = vst [vmem:[%s2104_s4 + $0x78] sm:$0xff] %v1265_v0 }
 0x76c   :  { %1281 = vst [vmem:[%s2104_s4 + $0x68] sm:$0xff] %v1257_v2 }

</bundles_post_ra>
